<compile_context>
chip_gen: v5e
topology: v5e:2x2
jax: 0.10.0
libtpu: 0.0.40
codegen_flags: <defaults>
</compile_context>

<pallas_src>
import jax
import jax.numpy as jnp
from jax.experimental import pallas as pl
from jax.experimental.pallas import tpu as pltpu


def _stack_relu_kernel(x_ref, y_ref, z_ref, w_ref, oxy_ref, ozw_ref):
    # ReLU on the VPU, stored straight into the stacked outputs
    # (slice-assign == stack along the leading axis; no temporaries).
    oxy_ref[0] = jnp.maximum(x_ref[...], 0.0)   # stack((x, y), dim=0) slot 0
    oxy_ref[1] = jnp.maximum(y_ref[...], 0.0)   # stack((x, y), dim=0) slot 1
    ozw_ref[0] = jnp.maximum(z_ref[...], 0.0)   # stack((z, w), dim=0) slot 0
    ozw_ref[1] = jnp.maximum(w_ref[...], 0.0)   # stack((z, w), dim=0) slot 1


def _vmem_spec():
    return pl.BlockSpec(memory_space=pltpu.MemorySpace.VMEM)


@jax.jit
def stack_relu(x, y, z, w):
    B, C, N = x.shape
    H, W = z.shape

    oxy, ozw = pl.pallas_call(
        _stack_relu_kernel,
        out_shape=(
            jax.ShapeDtypeStruct((2, B, C, N), x.dtype),   # relu(stack(x,y,dim=0))
            jax.ShapeDtypeStruct((2, H, W), z.dtype),      # relu(stack(z,w,dim=0))
        ),
        in_specs=[_vmem_spec(), _vmem_spec(), _vmem_spec(), _vmem_spec()],
        out_specs=(_vmem_spec(), _vmem_spec()),
    )(x, y, z, w)

    # Layout plumbing in the wrapper (fused by XLA):
    out0 = oxy                               # (2, B, C, N)  == stack dim=0
    out1 = jnp.transpose(oxy, (1, 2, 0, 3))  # (B, C, 2, N)  == stack dim=2
    out2 = jnp.transpose(ozw, (1, 2, 0))     # (H, W, 2)     == stack dim=2
    out3 = out2                              # dim=-1 == dim=2 for 2-D inputs
    return out0, out1, out2, out3


if __name__ == "__main__":
    key = jax.random.PRNGKey(0)
    kx, ky, kz, kw = jax.random.split(key, 4)

    # Small shapes consistent with the module's forward.
    x = jax.random.normal(kx, (2, 4, 16), dtype=jnp.float32)
    y = jax.random.normal(ky, (2, 4, 16), dtype=jnp.float32)
    z = jax.random.normal(kz, (8, 16), dtype=jnp.float32)
    w = jax.random.normal(kw, (8, 16), dtype=jnp.float32)

    out0, out1, out2, out3 = stack_relu(x, y, z, w)
    jax.block_until_ready((out0, out1, out2, out3))

    # Reference check (plain JAX).
    r0 = jax.nn.relu(jnp.stack([x, y], axis=0))
    r1 = jax.nn.relu(jnp.stack([x, y], axis=2))
    r2 = jax.nn.relu(jnp.stack([z, w], axis=2))
    r3 = jax.nn.relu(jnp.stack([z, w], axis=-1))

    assert out0.shape == (2, 2, 4, 16) and jnp.allclose(out0, r0)
    assert out1.shape == (2, 4, 2, 16) and jnp.allclose(out1, r1)
    assert out2.shape == (8, 16, 2) and jnp.allclose(out2, r2)
    assert out3.shape == (8, 16, 2) and jnp.allclose(out3, r3)

    print("KERNEL_OK")
</pallas_src>

<mosaic_0001>
module attributes {stable_mosaic.version = 11 : i64} {
  func.func @_stack_relu_kernel(%arg0: memref<2x4x16xf32, #tpu.memory_space<vmem>>, %arg1: memref<2x4x16xf32, #tpu.memory_space<vmem>>, %arg2: memref<8x16xf32, #tpu.memory_space<vmem>>, %arg3: memref<8x16xf32, #tpu.memory_space<vmem>>, %arg4: memref<2x2x4x16xf32, #tpu.memory_space<vmem>>, %arg5: memref<2x8x16xf32, #tpu.memory_space<vmem>>) attributes {dimension_semantics = [], scalar_prefetch = 0 : i64, scratch_operands = 0 : i64, tpu.core_type = #tpu.core_type<tc>} {
    %c0 = arith.constant 0 : index
    %c0_0 = arith.constant 0 : index
    %c0_1 = arith.constant 0 : index
    %0 = vector.load %arg0[%c0, %c0_0, %c0_1] : memref<2x4x16xf32, #tpu.memory_space<vmem>>, vector<2x4x16xf32>
    %cst = arith.constant 0.000000e+00 : f32
    %1 = vector.broadcast %cst : f32 to vector<2x4x16xf32>
    %2 = arith.maximumf %0, %1 : vector<2x4x16xf32>
    %c0_2 = arith.constant 0 : index
    %c0_3 = arith.constant 0 : index
    %c0_4 = arith.constant 0 : index
    %c0_5 = arith.constant 0 : index
    %3 = vector.load %arg4[%c0_2, %c0_3, %c0_4, %c0_5] : memref<2x2x4x16xf32, #tpu.memory_space<vmem>>, vector<1x2x4x16xf32>
    %4 = vector.shape_cast %3 : vector<1x2x4x16xf32> to vector<2x4x16xf32>
    %5 = vector.shape_cast %2 : vector<2x4x16xf32> to vector<1x2x4x16xf32>
    tpu.vector_store %arg4[%c0_2, %c0_3, %c0_4, %c0_5], %5 {strides = array<i32>} : memref<2x2x4x16xf32, #tpu.memory_space<vmem>>, vector<1x2x4x16xf32>,
    %c0_6 = arith.constant 0 : index
    %c0_7 = arith.constant 0 : index
    %c0_8 = arith.constant 0 : index
    %6 = vector.load %arg1[%c0_6, %c0_7, %c0_8] : memref<2x4x16xf32, #tpu.memory_space<vmem>>, vector<2x4x16xf32>
    %cst_9 = arith.constant 0.000000e+00 : f32
    %7 = vector.broadcast %cst_9 : f32 to vector<2x4x16xf32>
    %8 = arith.maximumf %6, %7 : vector<2x4x16xf32>
    %c1 = arith.constant 1 : index
    %c0_10 = arith.constant 0 : index
    %c0_11 = arith.constant 0 : index
    %c0_12 = arith.constant 0 : index
    %9 = vector.load %arg4[%c1, %c0_10, %c0_11, %c0_12] : memref<2x2x4x16xf32, #tpu.memory_space<vmem>>, vector<1x2x4x16xf32>
    %10 = vector.shape_cast %9 : vector<1x2x4x16xf32> to vector<2x4x16xf32>
    %11 = vector.shape_cast %8 : vector<2x4x16xf32> to vector<1x2x4x16xf32>
    tpu.vector_store %arg4[%c1, %c0_10, %c0_11, %c0_12], %11 {strides = array<i32>} : memref<2x2x4x16xf32, #tpu.memory_space<vmem>>, vector<1x2x4x16xf32>,
    %c0_13 = arith.constant 0 : index
    %c0_14 = arith.constant 0 : index
    %12 = vector.load %arg2[%c0_13, %c0_14] : memref<8x16xf32, #tpu.memory_space<vmem>>, vector<8x16xf32>
    %cst_15 = arith.constant 0.000000e+00 : f32
    %13 = vector.broadcast %cst_15 : f32 to vector<8x16xf32>
    %14 = arith.maximumf %12, %13 : vector<8x16xf32>
    %c0_16 = arith.constant 0 : index
    %c0_17 = arith.constant 0 : index
    %c0_18 = arith.constant 0 : index
    %15 = vector.load %arg5[%c0_16, %c0_17, %c0_18] : memref<2x8x16xf32, #tpu.memory_space<vmem>>, vector<1x8x16xf32>
    %16 = vector.shape_cast %15 : vector<1x8x16xf32> to vector<8x16xf32>
    %17 = vector.shape_cast %14 : vector<8x16xf32> to vector<1x8x16xf32>
    tpu.vector_store %arg5[%c0_16, %c0_17, %c0_18], %17 {strides = array<i32>} : memref<2x8x16xf32, #tpu.memory_space<vmem>>, vector<1x8x16xf32>,
    %c0_19 = arith.constant 0 : index
    %c0_20 = arith.constant 0 : index
    %18 = vector.load %arg3[%c0_19, %c0_20] : memref<8x16xf32, #tpu.memory_space<vmem>>, vector<8x16xf32>
    %cst_21 = arith.constant 0.000000e+00 : f32
    %19 = vector.broadcast %cst_21 : f32 to vector<8x16xf32>
    %20 = arith.maximumf %18, %19 : vector<8x16xf32>
    %c1_22 = arith.constant 1 : index
    %c0_23 = arith.constant 0 : index
    %c0_24 = arith.constant 0 : index
    %21 = vector.load %arg5[%c1_22, %c0_23, %c0_24] : memref<2x8x16xf32, #tpu.memory_space<vmem>>, vector<1x8x16xf32>
    %22 = vector.shape_cast %21 : vector<1x8x16xf32> to vector<8x16xf32>
    %23 = vector.shape_cast %20 : vector<8x16xf32> to vector<1x8x16xf32>
    tpu.vector_store %arg5[%c1_22, %c0_23, %c0_24], %23 {strides = array<i32>} : memref<2x8x16xf32, #tpu.memory_space<vmem>>, vector<1x8x16xf32>,
    return
  }
}

</mosaic_0001>

<bundles_post_ra>
// kernel: stack_relu.1
= control target key start
LH: loop header
LB: loop body
LE: loop exit
PB: predicated region body
PF: predicated region fallthrough
CT: control target
= control target key end

     0   :  { %11 = vsyncpa [#allocation3], 0  ;;  %s292_s0 = inlined_call_operand.hbm [shape: f32[2,4,16], index: 0, kind: input, shape index: {}]   ;;  %s293_s1 = inlined_call_operand.hbm [shape: f32[2,4,16], index: 1, kind: input, shape index: {}]   ;;  %s294_s2 = inlined_call_operand.hbm [shape: f32[8,16], index: 2, kind: input, shape index: {}]   ;;  %s295_s3 = inlined_call_operand.hbm [shape: f32[8,16], index: 3, kind: input, shape index: {}]   ;;  %s296_s4 = inlined_call_operand.vmem [shape: f32[2,2,4,16], index: 4, kind: output, shape index: {0}]   ;;  %s297_s5 = inlined_call_operand.vmem [shape: f32[2,8,16], index: 5, kind: output, shape index: {1}]  }
   0x1   :  { %12 = vsyncpa [#allocation5], 0 }
   0x2   :  { %13 = vsyncpa [#allocation8], 0  ;;  %s31_s20 = sshll.u32 %s293_s1, 4  ;;  %s222_s21 = smov [#allocation4]   ;;  %s32_s20 = int_to_ptr.hbm [resolvable:$true] %s31_s20 }
   0x3   :  { %s33_s22 = sshll.u32 %s222_s21, 4  ;;  %s18_s25 = sshll.u32 %s292_s0, 4  ;;  %s34_s22 = int_to_ptr.vmem [resolvable:$true] %s33_s22  ;;  %s19_s25 = int_to_ptr.hbm [resolvable:$true] %s18_s25 }
   0x4   :  { %s223_s26 = smov 64   ;;  %s224_s27 = smov 4  }
   0x5   :  { %39 = dma.hbm_to_vmem [thread:$0]  %s32_s20, 128, %s34_s22, [#allocation5], %s223_s26, %s223_s26, %s224_s27  }
   0x6   :  { %s225_s28 = smov [#allocation2]   ;;  %s45_s7 = sshll.u32 %s294_s2, 4  ;;  %s46_s7 = int_to_ptr.hbm [resolvable:$true] %s45_s7 }
   0x7   :  { %s20_s29 = sshll.u32 %s225_s28, 4  ;;  %s56_s9 = sshll.u32 %s295_s3, 4  ;;  %s21_s29 = int_to_ptr.vmem [resolvable:$true] %s20_s29  ;;  %s57_s9 = int_to_ptr.hbm [resolvable:$true] %s56_s9 }
   0x8   :  { %26 = dma.hbm_to_vmem [thread:$0]  %s19_s25, 128, %s21_s29, [#allocation3], %s223_s26, %s223_s26, %s224_s27  }
   0x9   :  { %s226_s10 = smov [#allocation6]   ;;  %s227_s0 = smov [#allocation7]  }
   0xa   :  { %s47_s11 = sshll.u32 %s226_s10, 4  ;;  %s58_s12 = sshll.u32 %s227_s0, 4  ;;  %s48_s11 = int_to_ptr.vmem [resolvable:$true] %s47_s11  ;;  %s59_s12 = int_to_ptr.vmem [resolvable:$true] %s58_s12 }
   0xb   :  { %50 = dma.hbm_to_vmem [thread:$0]  %s46_s7, 128, %s48_s11, [#allocation5]  }
   0xc   :  { %61 = dma.hbm_to_vmem [thread:$0]  %s57_s9, 128, %s59_s12, [#allocation8]  }
   0xd   :  { %216 = dma.done.wait [#allocation3], 128  }
   0xe   :  { %217 = vsyncadd [#allocation3], 4294967168 }
   0xf   :  { %218 = dma.done.wait [#allocation5], 256  }
  0x10   :  { %219 = vsyncadd [#allocation5], 4294967040 }
  0x11   :  { %220 = dma.done.wait [#allocation8], 128  }
  0x12   :  { %221 = vsyncadd [#allocation8], 4294967168  ;;  %vm82_vm0 = vcmask 125952   ;;  %v78_v0 = vld [vmem:[#allocation2] sm:$0xf]  ;;  %v92_v7 = vld [vmem:[#allocation6] sm:$0xff] }
  0x13   :  { %v79_v1 = vld [vmem:[#allocation2 + $0x4] sm:$0xf]  ;;  %v85_v2 = vld [vmem:[#allocation4] sm:$0xf]  ;;  %v80_v3 = vmax.f32 %v78_v0, 0.0  ;;  %v96_v9 = vld [vmem:[#allocation7] sm:$0xff] }
  0x14   :  { %v81_v4 = vmax.f32 %v79_v1, 0.0  ;;  %v87_v5 = vmax.f32 %v85_v2, 0.0  ;;  %v86_v6 = vld [vmem:[#allocation4 + $0x4] sm:$0xf]  ;;  %v93_v10 = vmax.f32 %v92_v7, 0.0  ;;  %vm94_vm1 = vcmask 130048  }
  0x15   :  { %v88_v8 = vmax.f32 %v86_v6, 0.0  ;;  %83 = vst.msk [vmem:[%s296_s4] sm:$0xf] %vm82_vm0, %v80_v3  ;;  %v97_v11 = vmax.f32 %v96_v9, 0.0 }
  0x16   :  { %84 = vst.msk [vmem:[%s296_s4 + $0x4] sm:$0xf] %vm82_vm0, %v81_v4 }
  0x17   :  { %111 = vst.msk [vmem:[%s296_s4 + $0x8] sm:$0xf] %vm82_vm0, %v87_v5 }
  0x18   :  { %112 = vst.msk [vmem:[%s296_s4 + $0xc] sm:$0xf] %vm82_vm0, %v88_v8 }
  0x19   :  { %95 = vst.msk [vmem:[%s297_s5] sm:$0xff] %vm94_vm1, %v93_v10 }
  0x1a   :  { %113 = vst.msk [vmem:[%s297_s5 + $0x8] sm:$0xff] %vm94_vm1, %v97_v11 }
  0x1b   :  { %108 = vsyncpa [#allocation3], 1 }
  0x1c   :  { %109 = vsyncpa [#allocation5], 1 }
  0x1d   :  { %110 = vsyncpa [#allocation8], 1 }

</bundles_post_ra>
